<compile_context>
chip_gen: v5e
topology: v5e:2x2
jax: 0.10.0
libtpu: 0.0.40
codegen_flags: <defaults>
</compile_context>

<pallas_src>
import math

import jax
import jax.numpy as jnp
from jax import lax
from jax.experimental import pallas as pl
from jax.experimental.pallas import tpu as pltpu


def _mha_kernel(q_ref, k_ref, v_ref, wq_ref, bq_ref, wp_ref, bp_ref,
                o_ref, acc_ref):
    """One (batch, query-row-block, head) grid cell.

    q_ref:  (Sblk, E)  raw query rows (per-head projection fused here)
    k_ref:  (T, D)     pre-projected keys for this (batch, head)
    v_ref:  (T, D)     pre-projected values for this (batch, head)
    wq_ref: (E, D)     this head's query-projection columns (1/sqrt(D) folded in)
    bq_ref: (1, D)
    wp_ref: (D, E)     this head's rows of the output projection (Wp.T)
    bp_ref: (1, E)
    o_ref:  (Sblk, E)  written once, on the last head
    acc_ref:(Sblk, E)  f32 VMEM accumulator (lane-dense, persists across heads)
    """
    f32 = jnp.float32
    h = pl.program_id(2)

    @pl.when(h == 0)
    def _():
        acc_ref[...] = jnp.zeros_like(acc_ref)

    # Per-head query projection (scale already folded into wq/bq on the host).
    qh = jnp.dot(q_ref[...], wq_ref[...], preferred_element_type=f32) + bq_ref[...]

    # q @ k^T: contract the last axis of both operands (no k transpose relayout).
    att = lax.dot_general(qh, k_ref[...], (((1,), (1,)), ((), ())),
                          preferred_element_type=f32)                 # (Sblk, T)

    # TODO(synk): attn_mask masked_fill(-1e8) and training-mode dropout on `p`.
    # TODO(synk): flash-style T-tiled online softmax for production sequence lengths.
    att = att - jnp.max(att, axis=-1, keepdims=True)
    p = jnp.exp(att)
    # EUP approximate reciprocal (separate issue slot) instead of a VALU divide.
    p = p * pl.reciprocal(jnp.sum(p, axis=-1, keepdims=True), approx=True)

    ctx = jnp.dot(p.astype(v_ref.dtype), v_ref[...],
                  preferred_element_type=f32)                         # (Sblk, D)

    # Fused per-head output projection: lane-dense (Sblk, E) accumulation replaces
    # masked 16-lane-wide context stores plus a separate (Sblk,E)x(E,E) matmul.
    acc_ref[...] += jnp.dot(ctx, wp_ref[...], preferred_element_type=f32)

    @pl.when(h == pl.num_programs(2) - 1)
    def _():
        o_ref[...] = (acc_ref[...] + bp_ref[...]).astype(o_ref.dtype)


def multi_head_attention(query, key, value, params, num_heads, *,
                         attn_mask=None, q_block_rows=None):
    """query: (N, S, E), key/value: (N, T, E). Returns (N, S, E)."""
    # TODO(synk): masked attention path; only the attn_mask=None forward is implemented.
    assert attn_mask is None, "attn_mask path not implemented in the Pallas kernel"

    N, S, E = query.shape
    _, T, _ = key.shape
    H = num_heads
    assert E % H == 0
    D = E // H
    dtype = query.dtype

    wq, bq, wk, bk, wv, bv, wp, bp = params
    scale = 1.0 / math.sqrt(D)

    # ---- host-side prep (computed ONCE per call, not per query-row block) ----
    # Hoisted K/V projections: with grid (N, Sblk, H) these would otherwise be
    # recomputed and re-DMA'd S/Sblk times per batch.
    wk_t, wv_t = wk.T, wv.T
    if key is value:
        # Fused (E, 2E) projection when key and value are the same tensor.
        kv = key @ jnp.concatenate([wk_t, wv_t], axis=1) + jnp.concatenate([bk, bv])
        k_proj, v_proj = kv[..., :E], kv[..., E:]
    else:
        k_proj = key @ wk_t + bk
        v_proj = value @ wv_t + bv
    # Per-head layout (N, H, T, D): head becomes a grid axis, every kernel block is
    # lane-dense (last dim = D is the full array dim; no in-kernel lane sub-slices).
    k_heads = k_proj.reshape(N, T, H, D).transpose(0, 2, 1, 3).astype(dtype)
    v_heads = v_proj.reshape(N, T, H, D).transpose(0, 2, 1, 3).astype(dtype)

    # Per-head query-projection weights with the 1/sqrt(D) score scale folded in.
    wq_h = (wq.T * scale).reshape(E, H, D).transpose(1, 0, 2).astype(dtype)  # (H, E, D)
    bq_h = (bq * scale).reshape(H, 1, D).astype(dtype)                       # (H, 1, D)
    # Per-head rows of the output projection: out = sum_h ctx_h @ Wp.T[hD:(h+1)D,:] + bp.
    wp_h = wp.T.reshape(H, D, E).astype(dtype)                               # (H, D, E)
    bp_r = bp.reshape(1, E).astype(dtype)

    # Query-row tiling: 128 matches the v5e MXU and keeps the v7x VMEM footprint small
    # (pass q_block_rows=256 on v6e when S permits).  Awkward S is padded to a multiple
    # of the block instead of falling back to a full-sequence block.
    if q_block_rows is None:
        q_block_rows = 128 if S > 128 else S
    s_blk = q_block_rows
    n_sblk = -(-S // s_blk)
    S_pad = n_sblk * s_blk
    if S_pad != S:
        query = jnp.pad(query, ((0, 0), (0, S_pad - S), (0, 0)))

    grid = (N, n_sblk, H)

    out = pl.pallas_call(
        _mha_kernel,
        out_shape=jax.ShapeDtypeStruct((N, S_pad, E), dtype),
        grid_spec=pltpu.PrefetchScalarGridSpec(
            num_scalar_prefetch=0,
            grid=grid,
            in_specs=[
                pl.BlockSpec((None, s_blk, E), lambda n, s, h: (n, s, 0)),       # query rows
                pl.BlockSpec((None, None, T, D), lambda n, s, h: (n, h, 0, 0)),  # K (head)
                pl.BlockSpec((None, None, T, D), lambda n, s, h: (n, h, 0, 0)),  # V (head)
                pl.BlockSpec((None, E, D), lambda n, s, h: (h, 0, 0)),           # Wq (head)
                pl.BlockSpec((None, 1, D), lambda n, s, h: (h, 0, 0)),           # bq (head)
                pl.BlockSpec((None, D, E), lambda n, s, h: (h, 0, 0)),           # Wp (head)
                pl.BlockSpec((1, E), lambda n, s, h: (0, 0)),                    # bp
            ],
            out_specs=pl.BlockSpec((None, s_blk, E), lambda n, s, h: (n, s, 0)),
            scratch_shapes=[pltpu.VMEM((s_blk, E), jnp.float32)],
        ),
        compiler_params=pltpu.CompilerParams(
            # batch and q-block axes parallel (v7x megacore); head axis accumulates.
            dimension_semantics=("parallel", "parallel", "arbitrary"),
            # Explicit budget: well under v7x's 64 MiB physical VMEM, above the 16/32 MiB
            # default scoped limits on v5e/v6e so double-buffered K/V blocks fit.
            vmem_limit_bytes=48 * 1024 * 1024,
        ),
    )(query, k_heads, v_heads, wq_h, bq_h, wp_h, bp_r)

    return out[:, :S, :] if S_pad != S else out


def _reference(query, key, value, params, num_heads):
    """Pure-JAX reference mirroring the PyTorch forward (no mask, eval dropout)."""
    wq, bq, wk, bk, wv, bv, wp, bp = params
    N, S, E = query.shape
    _, T, _ = key.shape
    D = E // num_heads
    q = (query @ wq.T + bq).reshape(N, S, num_heads, D).transpose(0, 2, 1, 3)
    k = (key @ wk.T + bk).reshape(N, T, num_heads, D).transpose(0, 2, 3, 1)
    v = (value @ wv.T + bv).reshape(N, T, num_heads, D).transpose(0, 2, 1, 3)
    att = (q @ k) / math.sqrt(D)
    p = jax.nn.softmax(att, axis=-1)
    out = (p @ v).transpose(0, 2, 1, 3).reshape(N, S, E)
    return out @ wp.T + bp


if __name__ == "__main__":
    # Small shapes consistent with the module: batch=2, seq=8, embed=32, heads=2.
    N, S, T, E, H = 2, 8, 8, 32, 2

    root = jax.random.PRNGKey(0)
    keys = jax.random.split(root, 11)

    # Deterministic nn.Linear-style init: U(-1/sqrt(E), 1/sqrt(E)).
    bound = 1.0 / math.sqrt(E)

    def lin(kw, kb):
        w = jax.random.uniform(kw, (E, E), jnp.float32, -bound, bound)
        b = jax.random.uniform(kb, (E,), jnp.float32, -bound, bound)
        return w, b

    wq, bq = lin(keys[0], keys[1])
    wk, bk = lin(keys[2], keys[3])
    wv, bv = lin(keys[4], keys[5])
    wp, bp = lin(keys[6], keys[7])
    params = (wq, bq, wk, bk, wv, bv, wp, bp)

    query = jax.random.normal(keys[8], (N, S, E), jnp.float32)
    key_in = jax.random.normal(keys[9], (N, T, E), jnp.float32)
    value = jax.random.normal(keys[10], (N, T, E), jnp.float32)

    out = multi_head_attention(query, key_in, value, params, H)
    out = jax.block_until_ready(out)

    ref = _reference(query, key_in, value, params, H)
    assert out.shape == (N, S, E)
    # Tolerance accounts for the EUP approximate reciprocal in the softmax
    # normalization; structural errors would be orders of magnitude larger.
    assert jnp.allclose(out, ref, atol=1e-2, rtol=1e-2), "mismatch vs reference"

    print("KERNEL_OK")
</pallas_src>

<mosaic_0001>
module attributes {stable_mosaic.version = 11 : i64} {
  func.func @_mha_kernel(%arg0: i32, %arg1: i32, %arg2: i32, %arg3: memref<1x8x32xf32, #tpu.memory_space<vmem>>, %arg4: memref<1x1x8x16xf32, #tpu.memory_space<vmem>>, %arg5: memref<1x1x8x16xf32, #tpu.memory_space<vmem>>, %arg6: memref<1x32x16xf32, #tpu.memory_space<vmem>>, %arg7: memref<1x1x16xf32, #tpu.memory_space<vmem>>, %arg8: memref<1x16x32xf32, #tpu.memory_space<vmem>>, %arg9: memref<1x32xf32, #tpu.memory_space<vmem>>, %arg10: memref<1x8x32xf32, #tpu.memory_space<vmem>>, %arg11: memref<8x32xf32, #tpu.memory_space<vmem>>) attributes {dimension_semantics = [#tpu.dimension_semantics<parallel>, #tpu.dimension_semantics<parallel>, #tpu.dimension_semantics<arbitrary>], iteration_bounds = array<i64: 2, 1, 2>, scalar_prefetch = 0 : i64, scratch_operands = 1 : i64, tpu.core_type = #tpu.core_type<tc>, window_params = [{transform_indices = @transform_0, window_bounds = array<i64: 1, 8, 32>}, {transform_indices = @transform_1, window_bounds = array<i64: 1, 1, 8, 16>}, {transform_indices = @transform_2, window_bounds = array<i64: 1, 1, 8, 16>}, {transform_indices = @transform_3, window_bounds = array<i64: 1, 32, 16>}, {transform_indices = @transform_4, window_bounds = array<i64: 1, 1, 16>}, {transform_indices = @transform_5, window_bounds = array<i64: 1, 16, 32>}, {pipeline_mode = #tpu.pipeline_mode<synchronous>, transform_indices = @transform_6, window_bounds = array<i64: 1, 32>}, {transform_indices = @transform_7, window_bounds = array<i64: 1, 8, 32>}]} {
    %c0_i32 = arith.constant 0 : i32
    %0 = arith.cmpi eq, %arg2, %c0_i32 : i32
    %1 = arith.extui %0 : i1 to i32
    %c0_i32_0 = arith.constant 0 : i32
    %2 = arith.cmpi ne, %1, %c0_i32_0 : i32
    scf.if %2 {
      %cst_30 = arith.constant 0.000000e+00 : f32
      %37 = vector.broadcast %cst_30 : f32 to vector<8x32xf32>
      %c0_31 = arith.constant 0 : index
      %c0_32 = arith.constant 0 : index
      %38 = vector.load %arg11[%c0_31, %c0_32] : memref<8x32xf32, #tpu.memory_space<vmem>>, vector<8x32xf32>
      tpu.vector_store %arg11[%c0_31, %c0_32], %37 {strides = array<i32>} : memref<8x32xf32, #tpu.memory_space<vmem>>, vector<8x32xf32>,
    } else {
    }
    %c0 = arith.constant 0 : index
    %c0_1 = arith.constant 0 : index
    %c0_2 = arith.constant 0 : index
    %3 = vector.load %arg3[%c0, %c0_1, %c0_2] : memref<1x8x32xf32, #tpu.memory_space<vmem>>, vector<1x8x32xf32>
    %4 = vector.shape_cast %3 : vector<1x8x32xf32> to vector<8x32xf32>
    %c0_3 = arith.constant 0 : index
    %c0_4 = arith.constant 0 : index
    %c0_5 = arith.constant 0 : index
    %5 = vector.load %arg6[%c0_3, %c0_4, %c0_5] : memref<1x32x16xf32, #tpu.memory_space<vmem>>, vector<1x32x16xf32>
    %6 = vector.shape_cast %5 : vector<1x32x16xf32> to vector<32x16xf32>
    %cst = arith.constant dense<0.000000e+00> : vector<8x16xf32>
    %7 = tpu.matmul %4, %6, %cst {dimension_numbers = #tpu.dot_dimension_numbers<[1], [0], [0], [1], [0, 0, 1, 1], [], []>} : vector<8x32xf32>, vector<32x16xf32>, vector<8x16xf32> -> vector<8x16xf32>
    %c0_6 = arith.constant 0 : index
    %c0_7 = arith.constant 0 : index
    %c0_8 = arith.constant 0 : index
    %8 = vector.load %arg7[%c0_6, %c0_7, %c0_8] : memref<1x1x16xf32, #tpu.memory_space<vmem>>, vector<1x1x16xf32>
    %9 = vector.shape_cast %8 : vector<1x1x16xf32> to vector<1x16xf32>
    %10 = vector.broadcast %9 : vector<1x16xf32> to vector<8x16xf32>
    %11 = arith.addf %7, %10 : vector<8x16xf32>
    %c0_9 = arith.constant 0 : index
    %c0_10 = arith.constant 0 : index
    %c0_11 = arith.constant 0 : index
    %c0_12 = arith.constant 0 : index
    %12 = vector.load %arg4[%c0_9, %c0_10, %c0_11, %c0_12] : memref<1x1x8x16xf32, #tpu.memory_space<vmem>>, vector<1x1x8x16xf32>
    %13 = vector.shape_cast %12 : vector<1x1x8x16xf32> to vector<8x16xf32>
    %cst_13 = arith.constant dense<0.000000e+00> : vector<8x8xf32>
    %14 = tpu.matmul %11, %13, %cst_13 {dimension_numbers = #tpu.dot_dimension_numbers<[1], [1], [0], [0], [0, 0, 1, 0], [], []>} : vector<8x16xf32>, vector<8x16xf32>, vector<8x8xf32> -> vector<8x8xf32>
    %cst_14 = arith.constant dense<0xFF800000> : vector<8xf32>
    %15 = vector.multi_reduction <maximumf>, %14, %cst_14 [1] : vector<8x8xf32> to vector<8xf32>
    %16 = vector.shape_cast %15 : vector<8xf32> to vector<8x1xf32>
    %17 = vector.broadcast %16 : vector<8x1xf32> to vector<8x8xf32>
    %18 = arith.subf %14, %17 : vector<8x8xf32>
    %19 = math.exp %18 : vector<8x8xf32>
    %cst_15 = arith.constant dense<0.000000e+00> : vector<8xf32>
    %20 = vector.multi_reduction <add>, %19, %cst_15 [1] : vector<8x8xf32> to vector<8xf32>
    %21 = vector.shape_cast %20 : vector<8xf32> to vector<8x1xf32>
    %22 = tpu.reciprocal %21 {approx = true} : vector<8x1xf32> -> vector<8x1xf32>
    %23 = vector.broadcast %22 : vector<8x1xf32> to vector<8x8xf32>
    %24 = arith.mulf %19, %23 : vector<8x8xf32>
    %c0_16 = arith.constant 0 : index
    %c0_17 = arith.constant 0 : index
    %c0_18 = arith.constant 0 : index
    %c0_19 = arith.constant 0 : index
    %25 = vector.load %arg5[%c0_16, %c0_17, %c0_18, %c0_19] : memref<1x1x8x16xf32, #tpu.memory_space<vmem>>, vector<1x1x8x16xf32>
    %26 = vector.shape_cast %25 : vector<1x1x8x16xf32> to vector<8x16xf32>
    %cst_20 = arith.constant dense<0.000000e+00> : vector<8x16xf32>
    %27 = tpu.matmul %24, %26, %cst_20 {dimension_numbers = #tpu.dot_dimension_numbers<[1], [0], [0], [1], [0, 0, 1, 1], [], []>} : vector<8x8xf32>, vector<8x16xf32>, vector<8x16xf32> -> vector<8x16xf32>
    %c0_21 = arith.constant 0 : index
    %c0_22 = arith.constant 0 : index
    %28 = vector.load %arg11[%c0_21, %c0_22] : memref<8x32xf32, #tpu.memory_space<vmem>>, vector<8x32xf32>
    %c0_23 = arith.constant 0 : index
    %c0_24 = arith.constant 0 : index
    %c0_25 = arith.constant 0 : index
    %29 = vector.load %arg8[%c0_23, %c0_24, %c0_25] : memref<1x16x32xf32, #tpu.memory_space<vmem>>, vector<1x16x32xf32>
    %30 = vector.shape_cast %29 : vector<1x16x32xf32> to vector<16x32xf32>
    %cst_26 = arith.constant dense<0.000000e+00> : vector<8x32xf32>
    %31 = tpu.matmul %27, %30, %cst_26 {dimension_numbers = #tpu.dot_dimension_numbers<[1], [0], [0], [1], [0, 0, 1, 1], [], []>} : vector<8x16xf32>, vector<16x32xf32>, vector<8x32xf32> -> vector<8x32xf32>
    %32 = arith.addf %28, %31 : vector<8x32xf32>
    %c0_27 = arith.constant 0 : index
    %c0_28 = arith.constant 0 : index
    %33 = vector.load %arg11[%c0_27, %c0_28] : memref<8x32xf32, #tpu.memory_space<vmem>>, vector<8x32xf32>
    tpu.vector_store %arg11[%c0_27, %c0_28], %32 {strides = array<i32>} : memref<8x32xf32, #tpu.memory_space<vmem>>, vector<8x32xf32>,
    %c1_i32 = arith.constant 1 : i32
    %34 = arith.cmpi eq, %arg2, %c1_i32 : i32
    %35 = arith.extui %34 : i1 to i32
    %c0_i32_29 = arith.constant 0 : i32
    %36 = arith.cmpi ne, %35, %c0_i32_29 : i32
    scf.if %36 {
      %c0_30 = arith.constant 0 : index
      %c0_31 = arith.constant 0 : index
      %37 = vector.load %arg11[%c0_30, %c0_31] : memref<8x32xf32, #tpu.memory_space<vmem>>, vector<8x32xf32>
      %c0_32 = arith.constant 0 : index
      %c0_33 = arith.constant 0 : index
      %38 = vector.load %arg9[%c0_32, %c0_33] : memref<1x32xf32, #tpu.memory_space<vmem>>, vector<1x32xf32>
      %39 = vector.broadcast %38 : vector<1x32xf32> to vector<8x32xf32>
      %40 = arith.addf %37, %39 : vector<8x32xf32>
      %c0_34 = arith.constant 0 : index
      %c0_35 = arith.constant 0 : index
      %c0_36 = arith.constant 0 : index
      %41 = vector.load %arg10[%c0_34, %c0_35, %c0_36] : memref<1x8x32xf32, #tpu.memory_space<vmem>>, vector<1x8x32xf32>
      %42 = vector.shape_cast %41 : vector<1x8x32xf32> to vector<8x32xf32>
      %43 = vector.shape_cast %40 : vector<8x32xf32> to vector<1x8x32xf32>
      tpu.vector_store %arg10[%c0_34, %c0_35, %c0_36], %43 {strides = array<i32>} : memref<1x8x32xf32, #tpu.memory_space<vmem>>, vector<1x8x32xf32>,
    } else {
    }
    return
  }
  func.func @transform_0(%arg0: i32, %arg1: i32, %arg2: i32) -> (i32, i32, i32) {
    %c0_i32 = arith.constant 0 : i32
    %c0_i32_0 = arith.constant 0 : i32
    return %arg0, %arg1, %c0_i32 : i32, i32, i32
  }
  func.func @transform_1(%arg0: i32, %arg1: i32, %arg2: i32) -> (i32, i32, i32, i32) {
    %c0_i32 = arith.constant 0 : i32
    %c0_i32_0 = arith.constant 0 : i32
    %c0_i32_1 = arith.constant 0 : i32
    return %arg0, %arg2, %c0_i32, %c0_i32_0 : i32, i32, i32, i32
  }
  func.func @transform_2(%arg0: i32, %arg1: i32, %arg2: i32) -> (i32, i32, i32, i32) {
    %c0_i32 = arith.constant 0 : i32
    %c0_i32_0 = arith.constant 0 : i32
    %c0_i32_1 = arith.constant 0 : i32
    return %arg0, %arg2, %c0_i32, %c0_i32_0 : i32, i32, i32, i32
  }
  func.func @transform_3(%arg0: i32, %arg1: i32, %arg2: i32) -> (i32, i32, i32) {
    %c0_i32 = arith.constant 0 : i32
    %c0_i32_0 = arith.constant 0 : i32
    %c0_i32_1 = arith.constant 0 : i32
    return %arg2, %c0_i32, %c0_i32_0 : i32, i32, i32
  }
  func.func @transform_4(%arg0: i32, %arg1: i32, %arg2: i32) -> (i32, i32, i32) {
    %c0_i32 = arith.constant 0 : i32
    %c0_i32_0 = arith.constant 0 : i32
    %c0_i32_1 = arith.constant 0 : i32
    return %arg2, %c0_i32, %c0_i32_0 : i32, i32, i32
  }
  func.func @transform_5(%arg0: i32, %arg1: i32, %arg2: i32) -> (i32, i32, i32) {
    %c0_i32 = arith.constant 0 : i32
    %c0_i32_0 = arith.constant 0 : i32
    %c0_i32_1 = arith.constant 0 : i32
    return %arg2, %c0_i32, %c0_i32_0 : i32, i32, i32
  }
  func.func @transform_6(%arg0: i32, %arg1: i32, %arg2: i32) -> (i32, i32) {
    %c0_i32 = arith.constant 0 : i32
    %c0_i32_0 = arith.constant 0 : i32
    %c0_i32_1 = arith.constant 0 : i32
    return %c0_i32, %c0_i32_0 : i32, i32
  }
  func.func @transform_7(%arg0: i32, %arg1: i32, %arg2: i32) -> (i32, i32, i32) {
    %c0_i32 = arith.constant 0 : i32
    %c0_i32_0 = arith.constant 0 : i32
    return %arg0, %arg1, %c0_i32 : i32, i32, i32
  }
}

</mosaic_0001>

<bundles_post_ra>
// kernel: tpu_custom_call.1
= control target key start
LH: loop header
LB: loop body
LE: loop exit
PB: predicated region body
PF: predicated region fallthrough
CT: control target
= control target key end

     0   :  { %s1227_s0 = inlined_call_operand.hbm [shape: f32[2,8,32], index: 0, kind: input, shape index: {}]   ;;  %s1228_s1 = inlined_call_operand.vmem [shape: f32[2,2,8,16], index: 1, kind: input, shape index: {}]   ;;  %s1229_s2 = inlined_call_operand.vmem [shape: f32[2,2,8,16], index: 2, kind: input, shape index: {}]   ;;  %s1230_s3 = inlined_call_operand.vmem [shape: f32[2,32,16], index: 3, kind: input, shape index: {}]   ;;  %s1231_s4 = inlined_call_operand.vmem [shape: f32[2,1,16], index: 4, kind: input, shape index: {}]   ;;  %s1232_s5 = inlined_call_operand.vmem [shape: f32[2,16,32], index: 5, kind: input, shape index: {}]   ;;  %s1233_s6 = inlined_call_operand.vmem [shape: f32[1,32], index: 6, kind: input, shape index: {}]   ;;  %s1234_s7 = inlined_call_operand.hbm [shape: f32[2,8,32], index: 7, kind: output, shape index: {}]  }
   0x1   :  { %1245 = sst [smem:[#allocation19_spill]] %s1227_s0 }
   0x2   :  { %1246 = sst [smem:[#allocation20_spill]] %s1234_s7 }
   0x3   :  { %12 = vsyncpa [#allocation4], 0 }
   0x4   :  { %14 = vsyncpa [#allocation4 + $0x1], 0 }
   0x5   :  { %15 = vsyncpa [#allocation5], 0 }
   0x6   :  { %17 = vsyncpa [#allocation5 + $0x1], 0  ;;  %s1036_s24 = smov 0   ;;  %s1038_s25 = smov 0  }
   0x7   :  { %s1040_s26 = smov 0   ;;  %s1042_s27 = smov 0  }
   0x8   :  { %s1044_s28 = smov 0   ;;  %s1046_s29 = smov 0  }
   0x9   :  { %s1048_s30 = smov 0   ;;  %s1050_s8 = smov 0  }
   0xa LB: > { %1247 = sst [smem:[#allocation9_spill]] %s965_s24  ;;  %s750_s9 = sadd.s32 4294967295, %s993_s8   ;;  %s993_s8 = sphi %s1050_s8, %s23_s8   ;;  %s989_s30 = sphi %s1048_s30, %s1273_s30   ;;  %s985_s29 = sphi %s1046_s29, %s1272_s29   ;;  %s981_s28 = sphi %s1044_s28, %s1271_s28   ;;  %s977_s27 = sphi %s1042_s27, %s1270_s27   ;;  %s973_s26 = sphi %s1040_s26, %s1269_s26   ;;  %s969_s25 = sphi %s1038_s25, %s1268_s25   ;;  %s965_s24 = sphi %s1036_s24, %s1267_s24  }
   0xb   : > { %1248 = sst [smem:[#allocation10_spill]] %s969_s25  ;;  %s751_s10 = sadd.s32 4294967294, %s993_s8  }
   0xc   : > { %1249 = sst [smem:[#allocation11_spill]] %s973_s26  ;;  %s35_s11 = sadd.s32 1, %s985_s29 }
   0xd   : > { %1250 = sst [smem:[#allocation12_spill]] %s985_s29  ;;  %s42_s12 = sadd.s32 1, %s989_s30 }
   0xe   : > { %1251 = sst [smem:[#allocation13_spill]] %s989_s30  ;;  %p36_p0 = scmp.ge.s32.totalorder %s35_s11, 2 }
   0xf   : > { %1252 = sst [smem:[#allocation14_spill]] %s993_s8  ;;  %s51_s13 = sadd.s32 1, %s973_s26 }
  0x10   : > { %p58_p1 = scmp.ne.s32.totalorder %s973_s26, %s969_s25  ;;  %p59_p2 = scmp.eq.s32.totalorder %s993_s8, 0 }
  0x11   : > { %s1275_s11 = smov (%p36_p0, %s35_s11), 0  ;;  %s1277_s12 = smov (!%p36_p0, %s42_s12), %s989_s30 }
  0x12   : > { %1253 = sst [smem:[#allocation15_spill]] %s1275_s11  ;;  %p1087_p3 = por %p59_p2, %p58_p1 }
  0x13   : > { %p64_p4 = scmp.ne.s32.totalorder %s969_s25, %s965_s24  ;;  %p44_p5 = scmp.ge.s32.totalorder %s1277_s12, 2 }
  0x14   : > { %p65_p6 = scmp.eq.s32.totalorder %s750_s9, 0  ;;  %p245_p7 = scmp.eq.s32.totalorder %s750_s9, 3 }
  0x15   : > { %p251_p8 = scmp.eq.s32.totalorder %s751_s10, 3  ;;  %s1279_s12 = smov (%p44_p5, %s1277_s12), 0 }
  0x16   : > { %1255 = sst [smem:[#allocation16_spill]] %s1279_s12  ;;  %p1095_p9 = por %p65_p6, %p64_p4 }
  0x17   : > { %p1099_p10 = por %p245_p7, %p58_p1  ;;  %s46_s17 = ssub.s32 %s989_s30, %s1279_s12 }
  0x18   : > { %p1105_p11 = por %p251_p8, %p64_p4  ;;  %p49_p12 = scmp.eq.s32.totalorder %s46_s17, 0 }
  0x19   : > { %p792_p13 = scmp.lt.s32.totalorder %s993_s8, 4  ;;  %s274_s19 = sand.u32 1, %s973_s26  }
  0x1a   : > { %s1258_s18 = scalar_select %p1105_p11, 1, 0 }
  0x1b   : > { %s1112_s20 = scalar_select %p49_p12, %s973_s26, %s51_s13  }
  0x1c   : > { %1259 = sst [smem:[#allocation17_spill]] %s1258_s18  ;;  %s754_s21 = sshll.u32 %s274_s19, 3 }
  0x1d   : > { %1260 = sst [smem:[#allocation18_spill]] %s1112_s20  ;;  %s755_s22 = sshll.u32 %s989_s30, 3 }
  0x1e   : > { %s1261_s0 = sld [smem:[#allocation19_spill]]  ;;  %s278_s11 = scalar_lea.vmem [#allocation3], %s754_s21 }
  0x1f   : > { %s287_s29 = sshll.u32 %s278_s11, 4  ;;  %p785_p0 = pnand %p792_p13, %p1087_p3  ;;  %s288_s29 = int_to_ptr.vmem [resolvable:$true] %s287_s29 }
  0x20   : > { %p756_p1 = scmp.ge.s32.totalorder %s993_s8, 1  ;;  %p336_p2 = scmp.lt.s32.totalorder %s993_s8, 5 }
  0x21   : > { %s275_s17 = scalar_lea.sflag [#allocation4], %s274_s19 }
  0x22   : > { %p337_p4 = pnand %p756_p1, %p336_p2 }
  0x23   : > { %s1123_s13 = sand.u32 (!%p337_p4), 1, %s969_s25  }
  0x24   : > { %s283_s10 = scalar_lea.hbm %s1261_s0, %s755_s22  ;;  %340 = sbr.rel (%p337_p4) target bundleno = 872 (0x368), region = 48 }
  0x25   : > { %s285_s24 = sshll.u32 %s283_s10, 4  ;;  %s757_s22 = sshll.u32 (!%p337_p4), %s1123_s13, 3  ;;  %s286_s24 = int_to_ptr.hbm [resolvable:$true] %s285_s24 }
  0x26   : > { %787 = dma.hbm_to_vmem [thread:$0]  (!%p785_p0), %s286_s24, 128, %s288_s29, %s275_s17  }
  0x27   : > { %s343_s21 = scalar_lea.sflag (!%p337_p4), [#allocation4], %s1123_s13  ;;  %s1127_s11 = scalar_lea.vmem (!%p337_p4), [#allocation3], %s757_s22 }
  0x29   : > { %956 = dma.done.wait (%p1095_p9), %s343_s21, 128  }
  0x2a   : > { %958 = vsyncadd (%p1095_p9), %s343_s21, 4294967168  ;;  %p407_p3 = scmp.lt.s32.totalorder %s981_s28, 1  ;;  %p409_p5 = scmp.lt.s32.totalorder %s977_s27, 1 }
  0x2b   : > { %p767_p6 = scmp.ne.s32.totalorder %s977_s27, 0 }
  0x2c   : > { %s408_s24 = scalar_select %p407_p3, %s981_s28, 1 }
  0x2d   : > { %s1137_s29 = scalar_select %p409_p5, %s977_s27, 1 }
  0x2e   : > { %s759_s14 = sshll.u32 %s408_s24, 1 }
  0x2f   : > { %s412_s19 = sadd.s32 %s759_s14, %s1137_s29  ;;  %s778_s23 = sshll.u32 %s1137_s29, 5 }
  0x30   : > { %s760_s9 = sshll.u32 %s412_s19, 3  ;;  %s427_s17 = scalar_lea.vmem %s1230_s3, %s778_s23 }
  0x31   : > { %s414_s12 = scalar_lea.vmem %s1228_s1, %s760_s9  ;;  %s1150_s26 = scalar_lea.vmem %s1229_s2, %s760_s9 }
  0x32   : > { %s430_s24 = scalar_lea.vmem %s1231_s4, %s1137_s29  ;;  %s779_s14 = sshll.u32 %s1137_s29, 4 }
  0x33   : > { %s1160_s7 = scalar_lea.vmem %s1232_s5, %s779_s14  ;;  %s1162_s23 = scalar_lea.vmem [#allocation6], %s757_s22 }
  0x34   : > { %439 = sbr.rel (%p767_p6) target bundleno = 59 (0x3b), region = 56 }
  0x39   : > { %vm440_vm0 = vcmask 261120   ;;  %v995_v0 = vmov 0.0  }
  0x3a   : > { %441 = vst.msk [vmem:[#allocation2] sm:$0xff] %vm440_vm0, %v995_v0 }
  0x3b PF: > { %v446_v1 = vld [vmem:[%s427_s17 + $0x18] sm:$0xff]  ;;  %v445_v2 = vld [vmem:[%s427_s17 + $0x10] sm:$0xff]  ;;  %v444_v3 = vld [vmem:[%s427_s17 + $0x8] sm:$0xff]  ;;  %vm451_vm1 = vcmask 261120   ;;  %vm476_vm2 = vcmask 130048   ;;  %vm503_vm3 = vcmask 64512  }
  0x3c   : > { %467 = vmatpush.msra.mxu0 %v446_v1  ;;  %v443_v4 = vld [vmem:[%s427_s17] sm:$0xff]  ;;  %v442_v5 = vld [vmem:[%s1127_s11] sm:$0xff]  ;;  %p773_p7 = scmp.ne.s32.totalorder %s977_s27, 1 }
  0x3d   : > { %v475_v6 = vld [vmem:[%s414_s12] sm:$0xff]  ;;  %v541_v18 = vld [vmem:[%s1160_s7 + $0x8] sm:$0xff] }
  0x3e   : > { %468 = vmatpush.msra.mxu0 %v445_v2  ;;  %769 = vmatpush.xpose.msk.msra.mxu1 %vm476_vm2, %v475_v6  ;;  %v859_v7 = vld [vmem:[%s430_s24] ss:$0 sm:$0xff] }
  0x3f   : > { %v515_v17 = vld [vmem:[%s1150_s26] sm:$0xff]  ;;  %559 = vmatpush.msra.mxu3 %v541_v18 }
  0x40   : > { %469 = vmatpush.msra.mxu0 %v444_v3  ;;  %534 = vmatpush.msra.mxu2 %v515_v17  ;;  %v540_v22 = vld [vmem:[%s1160_s7] sm:$0xff] }
  0x41   : > { %560 = vmatpush.msra.mxu3 %v540_v22  ;;  %v539_v24 = vld [vmem:[#allocation2] sm:$0xff] }
  0x42   : > { %470 = vmatpush.msra.mxu0 %v443_v4 }
  0x43   : > { %768 = vmatmul.msk.f32.vlgmr.msra.gmra.mxu0 %vm451_vm1, %v442_v5 }
  0xc0   : > { %v472_v8 = vpop.f32.mrf.mxu0 }
  0xc1   : > { %v473_v9 = vadd.f32 %v859_v7, %v472_v8 }
  0xc3   : > { %770 = vmatmul.msk.f32.vlgmr.msra.gmra.mxu1 %vm476_vm2, %v473_v9 }
 0x140   : > { %v500_v10 = vpop.f32.mrf.mxu1 }
 0x141   : > { %v504_v11 = vsel %vm503_vm3, %v500_v10, -inf }
 0x142   : > { %505 = vmax.xlane.f32.xlu0 %v504_v11 }
 0x1b5   : > { %v506_v12 = vpop.xlane.xlu0 %505 }
 0x1b6   : > { %v507_v13 = vsub.f32 %v500_v10, %v506_v12 }
 0x1b8   : > { %v508_v14 = vmul.f32 1.442695, %v507_v13 }
 0x1ba   : > { %860 = vpow2.f32 %v508_v14 }
 0x1c0   : > { %v861_v15 = vpop.eup %860 }
 0x1c1   : > { %v510_v16 = vsel %vm503_vm3, %v861_v15, 0.0 }
 0x1c2   : > { %511 = vadd.xlane.f32.xlu0 %v510_v16 }
 0x235   : > { %v512_v19 = vpop.xlane.xlu0 %511 }
 0x236   : > { %862 = vrcp.f32 %v512_v19 }
 0x23c   : > { %v863_v20 = vpop.eup %862 }
 0x23d   : > { %v514_v21 = vmul.f32 %v863_v20, %v861_v15 }
 0x23f   : > { %771 = vmatmul.msk.f32.vlgmr.msra.gmra.mxu2 %vm503_vm3, %v514_v21 }
 0x2c2   : > { %v536_v23 = vpop.f32.mrf.mxu2 }
 0x2c3   : > { %772 = vmatmul.msk.f32.vlgmr.msra.gmra.mxu3 %vm476_vm2, %v536_v23 }
 0x345   : > { %570 = sbr.rel (%p773_p7) target bundleno = 852 (0x354), region = 60 }
 0x346   : > { %v562_v25 = vpop.f32.mrf.mxu3 }
 0x347   : > { %v565_v26 = vadd.f32 %v562_v25, %v539_v24 }
 0x349   : > { %566 = vst.msk [vmem:[#allocation2] sm:$0xff] %vm451_vm1, %v565_v26 }
 0x34a   : > { %v864_v28 = vld [vmem:[%s1233_s6] ss:$0 sm:$0xff] }
 0x350   : > { %v571_v27 = vld [vmem:[#allocation2] sm:$0xff] }
 0x351   : > { %v576_v29 = vadd.f32 %v864_v28, %v571_v27 }
 0x353   : > { %577 = vst.msk [vmem:[%s1162_s23] sm:$0xff] %vm451_vm1, %v576_v29 }
 0x354 PF: > { %s775_s7 = sshll.u32 %s981_s28, 3  ;;  %s1262_s8 = sld [smem:[#allocation20_spill]] }
 0x355   : > { %s592_s18 = sshll.u32 %s1162_s23, 4  ;;  %s579_s22 = scalar_lea.sflag [#allocation5], %s1123_s13  ;;  %s593_s18 = int_to_ptr.vmem [resolvable:$true] %s592_s18 }
 0x35a   : > { %s1263_s12 = smov %s1262_s8  ;;  %s590_s27 = scalar_lea.hbm %s1262_s8, %s775_s7 }
 0x35b   : > { %s594_s20 = sshll.u32 %s590_s27, 4  ;;  %s915_s28 = scalar_lea.hbm %s1263_s12, 16  ;;  %s595_s20 = int_to_ptr.hbm [resolvable:$true] %s594_s20 }
 0x35c   : > { %s909_s11 = sshra.s32 %s595_s20, 4  ;;  %s910_s11 = int_to_ptr.hbm [resolvable:$true] %s909_s11 }
 0x35d   : > { %s911_s29 = scalar_lea.hbm %s910_s11, 8  ;;  %p916_p13 = scmp.lt.s32.totalorder %s910_s11, %s1263_s12 }
 0x35e   : > { %p912_p8 = scmp.ne.s32.totalorder %s910_s11, %s911_s29  ;;  %p917_p0 = scmp.lt.s32.totalorder %s915_s28, %s911_s29 }
 0x360   : > { %p913_p9 = pnand %p912_p8, %p1099_p10  ;;  %p918_p1 = por %p917_p0, %p916_p13 }
 0x362   : > { %p914_p12 = pneg %p913_p9 }
 0x364   : > { %p919_p2 = pnand %p918_p1, %p914_p12 }
 0x366   : > { %922 = shalt.err (!%p919_p2)
}
 0x367   : > { %782 = dma.vmem_to_hbm [thread:$0]  (%p1099_p10), %s593_s18, 128, %s595_s20, %s579_s22  }
 0x368 PF: > { %s1264_s13 = sld [smem:[#allocation14_spill]] }
 0x369   : > { %s1265_s21 = sld [smem:[#allocation9_spill]] }
 0x36e   : > { %p793_p4 = scmp.ge.s32.totalorder %s1264_s13, 2 }
 0x36f   : > { %s606_s14 = sand.u32 1, %s1265_s21  }
 0x370   : > { %p789_p3 = pnand %p793_p4, %p1105_p11  ;;  %s607_s19 = scalar_lea.sflag [#allocation5], %s606_s14 }
 0x372   : > { %p790_p5 = pneg %p789_p3 }
 0x374   : > { %960 = dma.done.wait (%p790_p5), %s607_s19, 128  }
 0x375   : > { %962 = vsyncadd (%p790_p5), %s607_s19, 4294967168  ;;  %s23_s8 = sadd.s32 1, %s1264_s13   ;;  %s1267_s24 = sld [smem:[#allocation10_spill]] }
 0x376   : > { %p20_p6 = scmp.ge.s32.totalorder %s23_s8, 6   ;;  %s1268_s25 = sld [smem:[#allocation11_spill]] }
 0x377   : > { %s1269_s26 = sld [smem:[#allocation18_spill]] }
 0x378   : > { %s1270_s27 = sld [smem:[#allocation12_spill]]  ;;  %22 = sbr.rel (!%p20_p6) target bundleno = 10 (0xa), region = 116 }
 0x379   : > { %s1271_s28 = sld [smem:[#allocation13_spill]] }
 0x37a   : > { %s1272_s29 = sld [smem:[#allocation15_spill]] }
 0x37b   : > { %s1273_s30 = sld [smem:[#allocation16_spill]] }
 0x37d   :  { %613 = vsyncpa [#allocation4], 1 }
 0x37e   :  { %615 = vsyncpa [#allocation4 + $0x1], 1 }
 0x37f   :  { %616 = vsyncpa [#allocation5], 1 }
 0x380   :  { %618 = vsyncpa [#allocation5 + $0x1], 1 }

</bundles_post_ra>
